<compile_context>
chip_gen: v5e
topology: v5e:2x2
jax: 0.10.0
libtpu: 0.0.40
codegen_flags: <defaults>
</compile_context>

<pallas_src>
import functools

import jax
import jax.numpy as jnp
from jax.experimental import pallas as pl
from jax.experimental.pallas import tpu as pltpu


# Clamp the effective tile size so the double-buffered (ep, mask) tile pair plus
# scratch stays well under the tightest scoped-VMEM default (v5e: 16 MiB).
_MAX_SAFE_TILE_BYTES = 6 << 20


def _soloss_single_block_kernel(ep_ref, mask_ref, out_ref, *, batch, eps):
    """Fast path: whole CAM + mask channel 0 in one VMEM tile.  No scratch, no
    init/finalize predication — the fused dot/||a||^2/||b||^2 reductions and the
    final cosine are computed straight from the loaded vregs."""
    a = ep_ref[...].astype(jnp.float32)
    b = mask_ref[...].astype(jnp.float32)
    dot = jnp.sum(a * b)
    na = jnp.sqrt(jnp.sum(a * a))
    nb = jnp.sqrt(jnp.sum(b * b))
    # Match torch F.cosine_similarity: each norm clamped by eps separately.
    cos = dot / (jnp.maximum(na, jnp.float32(eps)) * jnp.maximum(nb, jnp.float32(eps)))
    out_ref[0, 0] = (1.0 - cos) / jnp.float32(batch)


def _soloss_tiled_kernel(ep_ref, mask_ref, out_ref, dot_acc, na_acc, nb_acc,
                         *, batch, eps, tile_h, valid_h, mask_tail):
    """Multi-tile reduction path for CAMs too large for one VMEM tile.
    Sequential ('arbitrary') grid over row tiles; three (1, W) column-partial
    accumulators in VMEM; tail rows of the last (partial) tile masked out."""
    i = pl.program_id(0)

    @pl.when(i == 0)
    def _init():
        dot_acc[...] = jnp.zeros_like(dot_acc)
        na_acc[...] = jnp.zeros_like(na_acc)
        nb_acc[...] = jnp.zeros_like(nb_acc)

    a = ep_ref[...].astype(jnp.float32)
    b = mask_ref[...].astype(jnp.float32)
    if mask_tail:
        # Rows past H in the last (padded) block hold undefined data: zero them.
        row = jax.lax.broadcasted_iota(jnp.int32, a.shape, 0) + i * tile_h
        keep = row < valid_h
        a = jnp.where(keep, a, 0.0)
        b = jnp.where(keep, b, 0.0)

    # One fused pass: three partial sums from the same loaded vregs, reduced
    # over rows only (cheap sublane reduce); lane reduce deferred to finalize.
    dot_acc[...] += jnp.sum(a * b, axis=0, keepdims=True)
    na_acc[...] += jnp.sum(a * a, axis=0, keepdims=True)
    nb_acc[...] += jnp.sum(b * b, axis=0, keepdims=True)

    @pl.when(i == pl.num_programs(0) - 1)
    def _finalize():
        dot = jnp.sum(dot_acc[...])
        na = jnp.sqrt(jnp.sum(na_acc[...]))
        nb = jnp.sqrt(jnp.sum(nb_acc[...]))
        cos = dot / (jnp.maximum(na, jnp.float32(eps)) * jnp.maximum(nb, jnp.float32(eps)))
        out_ref[0, 0] = (1.0 - cos) / jnp.float32(batch)


def _soloss_batched_kernel(ep_ref, mask_ref, out_ref, *, eps):
    """Per-sample single-block compute inside a grid over samples; writes the
    per-sample (1 - cos) into an SMEM loss vector."""
    n = pl.program_id(0)
    a = ep_ref[...].astype(jnp.float32)
    b = mask_ref[...].astype(jnp.float32)
    dot = jnp.sum(a * b)
    na = jnp.sqrt(jnp.sum(a * a))
    nb = jnp.sqrt(jnp.sum(b * b))
    cos = dot / (jnp.maximum(na, jnp.float32(eps)) * jnp.maximum(nb, jnp.float32(eps)))
    out_ref[n] = 1.0 - cos


def _pick_tile_rows(h, bytes_per_row, max_tile_bytes):
    """Rows per tile for the multi-tile path: a multiple of 32 (packing-safe for
    f32/bf16/int8 second-minor dims) that keeps the per-step tile pair under
    max_tile_bytes.  Only called when the full image does NOT fit, so cap < h."""
    cap = int(max_tile_bytes // max(bytes_per_row, 1))
    cap = max(32, (cap // 32) * 32)
    return min(cap, h)


def so_loss(ep, gt_mask, *, eps=1e-6, max_tile_bytes=2 << 20):
    """ep: (H, W) explanation map.  gt_mask: (B, C, H, W) NCHW mask (channel 0
    used).  Returns scalar (1 - cos) / B, matching SoLoss.forward."""
    B, C, H, W = gt_mask.shape
    assert ep.shape == (H, W), "ep must be a single (H, W) explanation map"
    # Original module flattens a single (H, W) CAM against gt_mask[:, 0]; the
    # cosine similarity along dim=0 only matches when B == 1.
    assert B == 1, "SoLoss semantics (single CAM vs gt_mask[:,0]) require batch == 1"

    max_tile_bytes = min(max_tile_bytes, _MAX_SAFE_TILE_BYTES)
    bytes_per_row = W * (ep.dtype.itemsize + gt_mask.dtype.itemsize)
    total_bytes = H * bytes_per_row

    if total_bytes <= max_tile_bytes:
        # --- Single-block fast path (the common case at 224x224). ---
        kernel = functools.partial(_soloss_single_block_kernel, batch=B, eps=eps)
        out = pl.pallas_call(
            kernel,
            out_shape=jax.ShapeDtypeStruct((1, 1), jnp.float32),
            grid_spec=pltpu.PrefetchScalarGridSpec(
                num_scalar_prefetch=0,
                grid=(1,),
                in_specs=[
                    pl.BlockSpec((H, W), lambda i: (0, 0)),
                    # Channel 0 selected via the BlockSpec: batch/channel dims are
                    # size-1 squeezed with index_map pinned at 0 -> only channel 0
                    # is DMA'd; kernel sees an (H, W) ref.
                    pl.BlockSpec((None, None, H, W), lambda i: (0, 0, 0, 0)),
                ],
                out_specs=pl.BlockSpec(memory_space=pltpu.SMEM),
            ),
            compiler_params=pltpu.CompilerParams(
                dimension_semantics=("arbitrary",),
            ),
        )(ep, gt_mask)
        return out[0, 0]

    # --- Multi-tile reduction path (large CAMs). ---
    tile_h = _pick_tile_rows(H, bytes_per_row, max_tile_bytes)
    grid_h = pl.cdiv(H, tile_h)
    mask_tail = (H % tile_h) != 0

    kernel = functools.partial(
        _soloss_tiled_kernel, batch=B, eps=eps,
        tile_h=tile_h, valid_h=H, mask_tail=mask_tail)
    out = pl.pallas_call(
        kernel,
        out_shape=jax.ShapeDtypeStruct((1, 1), jnp.float32),
        grid_spec=pltpu.PrefetchScalarGridSpec(
            num_scalar_prefetch=0,
            grid=(grid_h,),
            in_specs=[
                pl.BlockSpec((tile_h, W), lambda i: (i, 0)),
                pl.BlockSpec((None, None, tile_h, W), lambda i: (0, 0, i, 0)),
            ],
            out_specs=pl.BlockSpec(memory_space=pltpu.SMEM),
            scratch_shapes=[
                pltpu.VMEM((1, W), jnp.float32),  # dot partials (per column)
                pltpu.VMEM((1, W), jnp.float32),  # ||ep||^2 partials
                pltpu.VMEM((1, W), jnp.float32),  # ||mask||^2 partials
            ],
        ),
        compiler_params=pltpu.CompilerParams(
            dimension_semantics=("arbitrary",),
        ),
    )(ep, gt_mask)
    return out[0, 0]


def so_loss_batched(ep_batch, gt_mask_batch, *, eps=1e-6):
    """Amortized variant: N (ep, mask) pairs in one pallas_call.
    ep_batch: (N, H, W); gt_mask_batch: (N, C, H, W).  Returns (N,) of
    per-sample (1 - cos) — each entry equals SoLoss.forward with batch == 1."""
    N, H, W = ep_batch.shape
    Nm, C, Hm, Wm = gt_mask_batch.shape
    assert (Nm, Hm, Wm) == (N, H, W)
    sample_bytes = H * W * (ep_batch.dtype.itemsize + gt_mask_batch.dtype.itemsize)
    assert sample_bytes <= _MAX_SAFE_TILE_BYTES, (
        "per-sample image too large for the batched single-block path; "
        "call so_loss per sample instead")

    kernel = functools.partial(_soloss_batched_kernel, eps=eps)
    return pl.pallas_call(
        kernel,
        out_shape=jax.ShapeDtypeStruct((N,), jnp.float32),
        grid_spec=pltpu.PrefetchScalarGridSpec(
            num_scalar_prefetch=0,
            grid=(N,),
            in_specs=[
                pl.BlockSpec((None, H, W), lambda n: (n, 0, 0)),
                pl.BlockSpec((None, None, H, W), lambda n: (n, 0, 0, 0)),
            ],
            out_specs=pl.BlockSpec(memory_space=pltpu.SMEM),
        ),
        compiler_params=pltpu.CompilerParams(
            dimension_semantics=("arbitrary",),
        ),
    )(ep_batch, gt_mask_batch)


def so_loss_ref(ep, gt_mask, eps=1e-6):
    a = ep.reshape(-1).astype(jnp.float32)
    b = gt_mask[:, 0, :, :].reshape(-1).astype(jnp.float32)
    na = jnp.maximum(jnp.linalg.norm(a), eps)
    nb = jnp.maximum(jnp.linalg.norm(b), eps)
    cos = jnp.dot(a, b) / (na * nb)
    return (1.0 - cos) / gt_mask.shape[0]


if __name__ == "__main__":
    key = jax.random.PRNGKey(0)
    k_ep, k_mask, k_epb, k_maskb = jax.random.split(key, 4)

    # The module's GradCAM maps are bicubically interpolated to 224x224; B must be 1.
    B, C, H, W = 1, 3, 224, 224
    # Synthetic non-negative CAM standing in for the GradCAM output.
    ep = jax.nn.relu(jax.random.normal(k_ep, (H, W), dtype=jnp.float32))
    # Binary ground-truth mask kept in a narrow dtype (int8); cast to f32 in-kernel.
    gt_mask = (jax.random.uniform(k_mask, (B, C, H, W)) > 0.5).astype(jnp.int8)

    loss_ref = so_loss_ref(ep, gt_mask)

    # 1) Default config -> single-block fast path (no scratch, no pl.when).
    loss_fast = jax.block_until_ready(so_loss(ep, gt_mask))
    assert jnp.allclose(loss_fast, loss_ref, atol=1e-5), (loss_fast, loss_ref)

    # 2) Small max_tile_bytes (test-only) -> multi-tile reduction path with a
    #    non-divisible last tile, exercising the cdiv grid + tail-row masking.
    loss_tiled = jax.block_until_ready(so_loss(ep, gt_mask, max_tile_bytes=140 * 1024))
    assert jnp.allclose(loss_tiled, loss_ref, atol=1e-5), (loss_tiled, loss_ref)

    # 3) Batched variant: N samples, one pallas_call, per-sample losses.
    N, Hs, Ws = 4, 64, 64
    ep_b = jax.nn.relu(jax.random.normal(k_epb, (N, Hs, Ws), dtype=jnp.float32))
    mask_b = (jax.random.uniform(k_maskb, (N, C, Hs, Ws)) > 0.5).astype(jnp.int8)
    losses = jax.block_until_ready(so_loss_batched(ep_b, mask_b))
    losses_ref = jnp.stack(
        [so_loss_ref(ep_b[n], mask_b[n:n + 1]) for n in range(N)])
    assert jnp.allclose(losses, losses_ref, atol=1e-5), (losses, losses_ref)

    print("KERNEL_OK")
</pallas_src>

<mosaic_0001>
module attributes {stable_mosaic.version = 11 : i64} {
  func.func @_soloss_single_block_kernel(%arg0: i32, %arg1: memref<224x224xf32, #tpu.memory_space<vmem>>, %arg2: memref<1x1x224x224xi8, #tpu.memory_space<vmem>>, %arg3: memref<1x1xf32, #tpu.memory_space<smem>>) attributes {dimension_semantics = [#tpu.dimension_semantics<arbitrary>], iteration_bounds = array<i64: 1>, scalar_prefetch = 0 : i64, scratch_operands = 0 : i64, tpu.core_type = #tpu.core_type<tc>, window_params = [{pipeline_mode = #tpu.pipeline_mode<synchronous>, transform_indices = @transform_0, window_bounds = array<i64: 224, 224>}, {transform_indices = @transform_1, window_bounds = array<i64: 1, 1, 224, 224>}, {transform_indices = @transform_2, window_bounds = array<i64: 1, 1>}]} {
    %c0 = arith.constant 0 : index
    %c0_0 = arith.constant 0 : index
    %0 = vector.load %arg1[%c0, %c0_0] : memref<224x224xf32, #tpu.memory_space<vmem>>, vector<224x224xf32>
    %c0_1 = arith.constant 0 : index
    %c0_2 = arith.constant 0 : index
    %c0_3 = arith.constant 0 : index
    %c0_4 = arith.constant 0 : index
    %1 = vector.load %arg2[%c0_1, %c0_2, %c0_3, %c0_4] : memref<1x1x224x224xi8, #tpu.memory_space<vmem>>, vector<1x1x224x224xi8>
    %2 = vector.shape_cast %1 : vector<1x1x224x224xi8> to vector<224x224xi8>
    %3 = arith.sitofp %2 : vector<224x224xi8> to vector<224x224xf32>
    %4 = arith.mulf %0, %3 : vector<224x224xf32>
    %5 = vector.shape_cast %4 : vector<224x224xf32> to vector<1x224x224xf32>
    %cst = arith.constant dense<0.000000e+00> : vector<1xf32>
    %6 = vector.multi_reduction <add>, %5, %cst [1, 2] : vector<1x224x224xf32> to vector<1xf32>
    %7 = vector.shape_cast %6 : vector<1xf32> to vector<1x1x1xf32>
    %8 = vector.extract %7[0, 0, 0] : f32 from vector<1x1x1xf32>
    %9 = arith.mulf %0, %0 : vector<224x224xf32>
    %10 = vector.shape_cast %9 : vector<224x224xf32> to vector<1x224x224xf32>
    %cst_5 = arith.constant dense<0.000000e+00> : vector<1xf32>
    %11 = vector.multi_reduction <add>, %10, %cst_5 [1, 2] : vector<1x224x224xf32> to vector<1xf32>
    %12 = vector.shape_cast %11 : vector<1xf32> to vector<1x1x1xf32>
    %13 = vector.extract %12[0, 0, 0] : f32 from vector<1x1x1xf32>
    %14 = math.sqrt %13 : f32
    %15 = arith.mulf %3, %3 : vector<224x224xf32>
    %16 = vector.shape_cast %15 : vector<224x224xf32> to vector<1x224x224xf32>
    %cst_6 = arith.constant dense<0.000000e+00> : vector<1xf32>
    %17 = vector.multi_reduction <add>, %16, %cst_6 [1, 2] : vector<1x224x224xf32> to vector<1xf32>
    %18 = vector.shape_cast %17 : vector<1xf32> to vector<1x1x1xf32>
    %19 = vector.extract %18[0, 0, 0] : f32 from vector<1x1x1xf32>
    %20 = math.sqrt %19 : f32
    %cst_7 = arith.constant 9.99999997E-7 : f32
    %21 = arith.maximumf %14, %cst_7 : f32
    %cst_8 = arith.constant 9.99999997E-7 : f32
    %22 = arith.maximumf %20, %cst_8 : f32
    %23 = arith.mulf %21, %22 : f32
    %24 = arith.divf %8, %23 : f32
    %cst_9 = arith.constant 1.000000e+00 : f32
    %25 = arith.subf %cst_9, %24 : f32
    %cst_10 = arith.constant 1.000000e+00 : f32
    %26 = arith.divf %25, %cst_10 : f32
    %c0_11 = arith.constant 0 : index
    %c0_12 = arith.constant 0 : index
    %27 = memref.load %arg3[%c0_11, %c0_12] : memref<1x1xf32, #tpu.memory_space<smem>>
    memref.store %26, %arg3[%c0_11, %c0_12] : memref<1x1xf32, #tpu.memory_space<smem>>
    return
  }
  func.func @transform_0(%arg0: i32) -> (i32, i32) {
    %c0_i32 = arith.constant 0 : i32
    %c0_i32_0 = arith.constant 0 : i32
    %c0_i32_1 = arith.constant 0 : i32
    return %c0_i32, %c0_i32_0 : i32, i32
  }
  func.func @transform_1(%arg0: i32) -> (i32, i32, i32, i32) {
    %c0_i32 = arith.constant 0 : i32
    %c0_i32_0 = arith.constant 0 : i32
    %c0_i32_1 = arith.constant 0 : i32
    %c0_i32_2 = arith.constant 0 : i32
    %c0_i32_3 = arith.constant 0 : i32
    return %c0_i32, %c0_i32_0, %c0_i32_1, %c0_i32_2 : i32, i32, i32, i32
  }
  func.func @transform_2(%arg0: i32) -> (i32, i32) {
    %c0_i32 = arith.constant 0 : i32
    %c0_i32_0 = arith.constant 0 : i32
    %c0_i32_1 = arith.constant 0 : i32
    return %c0_i32, %c0_i32_0 : i32, i32
  }
}

</mosaic_0001>

<bundles_post_ra>
// kernel: tpu_custom_call.1
= control target key start
LH: loop header
LB: loop body
LE: loop exit
PB: predicated region body
PF: predicated region fallthrough
CT: control target
= control target key end

     0   :  { %7 = vsyncpa [#allocation3], 0  ;;  %s1426_s0 = inlined_call_operand.hbm [shape: f32[224,224], index: 0, kind: input, shape index: {}]   ;;  %s1427_s1 = inlined_call_operand.hbm [shape: s8[1,3,224,224], index: 1, kind: input, shape index: {}]   ;;  %s1428_s2 = inlined_call_operand.hbm [shape: f32[1,1], index: 2, kind: output, shape index: {}]  }
   0x1   :  { %8 = vsyncpa [#allocation6], 0 }
   0x2   :  { %9 = vsyncpa [#allocation4], 0  ;;  %s14_s11 = sshll.u32 %s1426_s0, 4  ;;  %s829_s12 = smov [#allocation2]   ;;  %s15_s11 = int_to_ptr.hbm [resolvable:$true] %s14_s11 }
   0x3   :  { %s16_s13 = sshll.u32 %s829_s12, 4  ;;  %s27_s16 = sshll.u32 %s1427_s1, 4  ;;  %s17_s13 = int_to_ptr.vmem [resolvable:$true] %s16_s13  ;;  %s28_s16 = int_to_ptr.hbm [resolvable:$true] %s27_s16 }
   0x4   :  { %s830_s17 = smov 256   ;;  %s831_s18 = smov 16  }
   0x5   :  { %22 = dma.hbm_to_vmem [thread:$0]  %s15_s11, 7168, %s17_s13, [#allocation3], %s830_s17, %s830_s17, %s831_s18  }
   0x6   :  { %s832_s19 = smov [#allocation5]  }
   0x7   :  { %s29_s20 = sshll.u32 %s832_s19, 4  ;;  %s30_s20 = int_to_ptr.vmem [resolvable:$true] %s29_s20 }
   0x8   :  { %35 = dma.hbm_to_vmem [thread:$0]  %s28_s16, 1792, %s30_s20, [#allocation6], %s830_s17, %s830_s17, %s831_s18  }
   0x9   :  { %823 = dma.done.wait [#allocation3], 7168  }
   0xa   :  { %824 = vsyncadd [#allocation3], 4294960128 }
   0xb   :  { %825 = dma.done.wait [#allocation6], 1792  }
   0xc   :  { %826 = vsyncadd [#allocation6], 4294965504  ;;  %v101_v0 = vld [vmem:[#allocation5 + $0x8] sm:$0xff]  ;;  %v100_v1 = vld [vmem:[#allocation5] sm:$0xff]  ;;  %vm282_vm0 = vcmask 785408   ;;  %s727_s30 = sshll.u32 %s1428_s2, 4  ;;  %s728_s30 = int_to_ptr.hbm [resolvable:$true] %s727_s30 }
   0xd   :  { %v115_v2 = vunpack.c.0.s8 %v101_v0  ;;  %v114_v3 = vunpack.c.0.s8 %v100_v1  ;;  %v117_v4 = vunpack.c.1.s8 %v101_v0  ;;  %v116_v5 = vunpack.c.1.s8 %v100_v1  ;;  %v45_v7 = vld [vmem:[#allocation2 + $0x8] sm:$0xff]  ;;  %v44_v9 = vld [vmem:[#allocation2] sm:$0xff]  ;;  %v860_v10 = vld [vmem:[#allocation5 + $0x10] sm:$0xff]  ;;  %s833_s24 = smov 1e-06   ;;  %s834_s6 = smov [#allocation7]  }
   0xe   :  { %v862_v11 = vld [vmem:[#allocation5 + $0x18] sm:$0xff]  ;;  %v119_v12 = vunpack.c.2.s8 %v101_v0  ;;  %v118_v15 = vunpack.c.2.s8 %v100_v1  ;;  %v46_v17 = vld [vmem:[#allocation2 + $0x10] sm:$0xff]  ;;  %v120_v18 = vunpack.c.3.s8 %v100_v1  ;;  %v121_v19 = vunpack.c.3.s8 %v101_v0  ;;  %v869_v21 = vld [vmem:[#allocation5 + $0x20] sm:$0xff] }
   0xf   :  { %v856_v6 = vcvt.s32.f32 %v115_v2  ;;  %v858_v8 = vcvt.s32.f32 %v114_v3  ;;  %v864_v13 = vcvt.s32.f32 %v117_v4  ;;  %v47_v14 = vld [vmem:[#allocation2 + $0x18] sm:$0xff]  ;;  %v866_v16 = vcvt.s32.f32 %v116_v5  ;;  %v871_v22 = vld [vmem:[#allocation5 + $0x28] sm:$0xff]  ;;  %v48_v36 = vld [vmem:[#allocation2 + $0x20] sm:$0xff] }
  0x10   :  { %v122_v23 = vunpack.c.0.s8 %v860_v10  ;;  %v123_v24 = vunpack.c.0.s8 %v862_v11  ;;  %v124_v25 = vunpack.c.1.s8 %v860_v10  ;;  %v125_v27 = vunpack.c.1.s8 %v862_v11  ;;  %v49_v31 = vld [vmem:[#allocation2 + $0x28] sm:$0xff]  ;;  %v891_v41 = vld [vmem:[#allocation5 + $0x30] sm:$0xff]  ;;  %v893_v42 = vld [vmem:[#allocation5 + $0x38] sm:$0xff] }
  0x11   :  { %v227_v20 = vmul.f32 %v856_v6, %v45_v7  ;;  %v226_v26 = vmul.f32 %v858_v8, %v44_v9  ;;  %v126_v28 = vunpack.c.2.s8 %v860_v10  ;;  %v879_v29 = vcvt.s32.f32 %v119_v12  ;;  %v51_v51 = vld [vmem:[#allocation2 + $0x38] sm:$0xff]  ;;  %v50_v56 = vld [vmem:[#allocation2 + $0x30] sm:$0xff]  ;;  %v53_v5 = vld [vmem:[#allocation2 + $0x48] sm:$0xff] }
  0x12   :  { %v229_v30 = vmul.f32 %v864_v13, %v47_v14  ;;  %v127_v32 = vunpack.c.2.s8 %v862_v11  ;;  %v128_v33 = vunpack.c.3.s8 %v860_v10  ;;  %v884_v34 = vcvt.s32.f32 %v118_v15  ;;  %v62_v62 = vld [vmem:[#allocation2 + $0x90] sm:$0xff] }
  0x13   :  { %v228_v35 = vmul.f32 %v866_v16, %v46_v17  ;;  %v129_v37 = vunpack.c.3.s8 %v862_v11  ;;  %v130_v38 = vunpack.c.0.s8 %v869_v21  ;;  %v131_v39 = vunpack.c.0.s8 %v871_v22 }
  0x14   :  { %v283_v40 = vsel %vm282_vm0, %v227_v20, 0.0  ;;  %v132_v43 = vunpack.c.1.s8 %v869_v21  ;;  %v133_v44 = vunpack.c.1.s8 %v871_v22  ;;  %v134_v45 = vunpack.c.2.s8 %v869_v21  ;;  %v54_v20 = vld [vmem:[#allocation2 + $0x50] sm:$0xff] }
  0x15   :  { %v284_v46 = vadd.f32 %v283_v40, %v226_v26  ;;  %v135_v47 = vunpack.c.2.s8 %v871_v22  ;;  %v899_v48 = vcvt.s32.f32 %v121_v19  ;;  %v231_v49 = vmul.f32 %v879_v29, %v49_v31  ;;  %v52_v19 = vld [vmem:[#allocation2 + $0x40] sm:$0xff] }
  0x16   :  { %v286_v50 = vsel %vm282_vm0, %v229_v30, 0.0  ;;  %v136_v52 = vunpack.c.3.s8 %v869_v21  ;;  %v904_v53 = vcvt.s32.f32 %v120_v18  ;;  %v230_v54 = vmul.f32 %v884_v34, %v48_v36  ;;  %v923_v30 = vld [vmem:[#allocation5 + $0x40] sm:$0xff] }
  0x17   :  { %v285_v55 = vadd.f32 %v284_v46, %v228_v35  ;;  %v137_v57 = vunpack.c.3.s8 %v871_v22  ;;  %v138_v58 = vunpack.c.0.s8 %v891_v41  ;;  %v139_v59 = vunpack.c.0.s8 %v893_v42  ;;  %v925_v35 = vld [vmem:[#allocation5 + $0x48] sm:$0xff] }
  0x18   :  { %v376_v60 = vmul.f32 %v45_v7, %v45_v7  ;;  %v375_v0 = vmul.f32 %v44_v9, %v44_v9  ;;  %v912_v1 = vcvt.s32.f32 %v123_v24  ;;  %v233_v2 = vmul.f32 %v899_v48, %v51_v51 }
  0x19   :  { %v287_v63 = vadd.f32 %v286_v50, %v285_v55  ;;  %v289_v3 = vsel %vm282_vm0, %v231_v49, 0.0  ;;  %v378_v4 = vmul.f32 %v47_v14, %v47_v14  ;;  %v916_v12 = vcvt.s32.f32 %v122_v23  ;;  %v55_v55 = vld [vmem:[#allocation2 + $0x58] sm:$0xff] }
  0x1a   :  { %v232_v15 = vmul.f32 %v904_v53, %v50_v56  ;;  %v377_v7 = vmul.f32 %v46_v17, %v46_v17  ;;  %v431_v24 = vsel %vm282_vm0, %v376_v60, 0.0  ;;  %v927_v14 = vcvt.s32.f32 %v124_v25  ;;  %v58_v25 = vld [vmem:[#allocation2 + $0x70] sm:$0xff] }
  0x1b   :  { %v288_v18 = vadd.f32 %v287_v63, %v230_v54  ;;  %v929_v23 = vcvt.s32.f32 %v125_v27  ;;  %v432_v46 = vadd.f32 %v431_v24, %v375_v0  ;;  %v235_v17 = vmul.f32 %v912_v1, %v53_v5  ;;  %v56_v27 = vld [vmem:[#allocation2 + $0x60] sm:$0xff] }
  0x1c   :  { %v292_v49 = vsel %vm282_vm0, %v233_v2, 0.0  ;;  %v380_v50 = vmul.f32 %v49_v31, %v49_v31  ;;  %v434_v54 = vsel %vm282_vm0, %v378_v4, 0.0  ;;  %v234_v60 = vmul.f32 %v916_v12, %v52_v19 }
  0x1d   :  { %v290_v40 = vadd.f32 %v289_v3, %v288_v18  ;;  %v379_v9 = vmul.f32 %v48_v36, %v48_v36  ;;  %v433_v26 = vadd.f32 %v432_v46, %v377_v7  ;;  %v941_v31 = vcvt.s32.f32 %v126_v28 }
  0x1e   :  { %v945_v2 = vcvt.s32.f32 %v127_v32  ;;  %v295_v18 = vsel %vm282_vm0, %v235_v17, 0.0  ;;  %v382_v7 = vmul.f32 %v51_v51, %v51_v51  ;;  %v437_v24 = vsel %vm282_vm0, %v380_v50, 0.0  ;;  %v957_v51 = vld [vmem:[#allocation5 + $0x58] sm:$0xff] }
  0x1f   :  { %v291_v63 = vadd.f32 %v290_v40, %v232_v15  ;;  %v435_v36 = vadd.f32 %v434_v54, %v433_v26  ;;  %v237_v15 = vmul.f32 %v929_v23, %v55_v55  ;;  %v57_v40 = vld [vmem:[#allocation2 + $0x68] sm:$0xff]  ;;  %v236_v46 = vmul.f32 %v927_v14, %v54_v20  ;;  %v955_v54 = vld [vmem:[#allocation5 + $0x50] sm:$0xff] }
  0x20   :  { %v381_v0 = vmul.f32 %v50_v56, %v50_v56  ;;  %v961_v17 = vcvt.s32.f32 %v128_v33  ;;  %v965_v56 = vcvt.s32.f32 %v129_v37  ;;  %v238_v26 = vmul.f32 %v941_v31, %v56_v27  ;;  %v60_v37 = vld [vmem:[#allocation2 + $0x80] sm:$0xff] }
  0x21   :  { %v293_v4 = vadd.f32 %v292_v49, %v291_v63  ;;  %v436_v28 = vadd.f32 %v435_v36, %v379_v9  ;;  %v298_v63 = vsel %vm282_vm0, %v237_v15, 0.0  ;;  %v440_v36 = vsel %vm282_vm0, %v382_v7, 0.0  ;;  %v59_v49 = vld [vmem:[#allocation2 + $0x78] sm:$0xff] }
  0x22   :  { %v383_v10 = vmul.f32 %v52_v19, %v52_v19  ;;  %v981_v15 = vcvt.s32.f32 %v131_v39  ;;  %v387_v11 = vmul.f32 %v56_v27, %v56_v27  ;;  %v1450_v21 = vunpack.c.1.s8 %v893_v42 }
  0x23   :  { %v294_v3 = vadd.f32 %v293_v4, %v234_v60  ;;  %v438_v50 = vadd.f32 %v437_v24, %v436_v28  ;;  %v239_v60 = vmul.f32 %v945_v2, %v57_v40  ;;  %v384_v4 = vmul.f32 %v53_v5, %v53_v5 }
  0x24   :  { %v977_v5 = vcvt.s32.f32 %v130_v38  ;;  %v1451_v61 = vunpack.c.2.s8 %v891_v41 }
  0x25   :  { %v296_v9 = vadd.f32 %v295_v18, %v294_v3  ;;  %v439_v33 = vadd.f32 %v438_v50, %v381_v0  ;;  %v241_v0 = vmul.f32 %v965_v56, %v59_v49  ;;  %v301_v24 = vsel %vm282_vm0, %v239_v60, 0.0 }
  0x26   :  { %v443_v28 = vsel %vm282_vm0, %v384_v4, 0.0  ;;  %v240_v50 = vmul.f32 %v961_v17, %v58_v25  ;;  %v385_v3 = vmul.f32 %v54_v20, %v54_v20  ;;  %v997_v60 = vcvt.s32.f32 %v132_v43 }
  0x27   :  { %v297_v32 = vadd.f32 %v296_v9, %v236_v46  ;;  %v441_v19 = vadd.f32 %v440_v36, %v439_v33  ;;  %v386_v46 = vmul.f32 %v55_v55, %v55_v55  ;;  %v61_v9 = vld [vmem:[#allocation2 + $0x88] sm:$0xff]  ;;  %v991_v36 = vld [vmem:[#allocation5 + $0x60] sm:$0xff]  ;;  %v1001_v20 = vcvt.s32.f32 %v133_v44 }
  0x28   :  { %1440 = vst [vmem:[#allocation11_spill] sm:$0xff] %v991_v36  ;;  %v993_v55 = vld [vmem:[#allocation5 + $0x68] sm:$0xff]  ;;  %v304_v33 = vsel %vm282_vm0, %v241_v0, 0.0  ;;  %v1017_v0 = vcvt.s32.f32 %v135_v47  ;;  %v64_v44 = vld [vmem:[#allocation2 + $0xa0] sm:$0xff]  ;;  %v1025_v47 = vcvt.s32.f32 %v136_v52  ;;  %v1045_v52 = vcvt.s32.f32 %v1450_v21 }
  0x29   :  { %v299_v7 = vadd.f32 %v298_v63, %v297_v32  ;;  %v442_v38 = vadd.f32 %v441_v19, %v383_v10  ;;  %1441 = vst [vmem:[#allocation12_spill] sm:$0xff] %v993_v55  ;;  %v243_v10 = vmul.f32 %v981_v15, %v61_v9  ;;  %v446_v19 = vsel %vm282_vm0, %v386_v46, 0.0  ;;  %v63_v63 = vld [vmem:[#allocation2 + $0x98] sm:$0xff] }
  0x2a   :  { %1442 = vst [vmem:[#allocation13_spill] sm:$0xff] %v1001_v20  ;;  %v242_v32 = vmul.f32 %v977_v5, %v60_v37  ;;  %v1053_v21 = vcvt.s32.f32 %v1451_v61  ;;  %v1456_v61 = vunpack.c.0.s8 %v925_v35  ;;  %v1457_v55 = vunpack.c.1.s8 %v923_v30 }
  0x2b   :  { %v300_v18 = vadd.f32 %v299_v7, %v238_v26  ;;  %v444_v4 = vadd.f32 %v443_v28, %v442_v38  ;;  %v388_v7 = vmul.f32 %v57_v40, %v57_v40  ;;  %v1013_v40 = vcvt.s32.f32 %v134_v45  ;;  %1444 = vst [vmem:[#allocation15_spill] sm:$0xff] %v1017_v0 }
  0x2c   :  { %v307_v28 = vsel %vm282_vm0, %v243_v10, 0.0  ;;  %v1037_v10 = vcvt.s32.f32 %v139_v59 }
  0x2d   :  { %v302_v26 = vadd.f32 %v301_v24, %v300_v18  ;;  %v445_v43 = vadd.f32 %v444_v4, %v385_v3  ;;  %1443 = vst [vmem:[#allocation14_spill] sm:$0xff] %v1013_v40  ;;  %v245_v3 = vmul.f32 %v1001_v20, %v63_v63  ;;  %v449_v38 = vsel %vm282_vm0, %v388_v7, 0.0 }
  0x2e   :  { %v244_v4 = vmul.f32 %v997_v60, %v62_v62  ;;  %v389_v18 = vmul.f32 %v58_v25, %v58_v25  ;;  %1447 = vst [vmem:[#allocation18_spill] sm:$0xff] %v1037_v10  ;;  %v1448_v25 = vunpack.c.1.s8 %v891_v41  ;;  %v246_v59 = vmul.f32 %v1013_v40, %v64_v44 }
  0x2f   :  { %v303_v39 = vadd.f32 %v302_v26, %v240_v50  ;;  %v447_v27 = vadd.f32 %v446_v19, %v445_v43  ;;  %v390_v50 = vmul.f32 %v59_v49, %v59_v49  ;;  %v65_v26 = vld [vmem:[#allocation2 + $0xa8] sm:$0xff]  ;;  %v1033_v49 = vcvt.s32.f32 %v138_v58  ;;  %v67_v19 = vld [vmem:[#allocation2 + $0xb8] sm:$0xff] }
  0x30   :  { %v392_v58 = vmul.f32 %v61_v9, %v61_v9  ;;  %v393_v40 = vmul.f32 %v62_v62, %v62_v62  ;;  %v1083_v20 = vcvt.s32.f32 %v1457_v55  ;;  %v537_v55 = vmul.f32 %v858_v8, %v858_v8 }
  0x31   :  { %v305_v46 = vadd.f32 %v304_v33, %v303_v39  ;;  %v448_v45 = vadd.f32 %v447_v27, %v387_v11  ;;  %v1029_v39 = vcvt.s32.f32 %v137_v57  ;;  %1446 = vst [vmem:[#allocation17_spill] sm:$0xff] %v1033_v49  ;;  %v1041_v11 = vcvt.s32.f32 %v1448_v25  ;;  %v66_v25 = vld [vmem:[#allocation2 + $0xb0] sm:$0xff] }
  0x32   :  { %v247_v57 = vmul.f32 %v1017_v0, %v65_v26  ;;  %v310_v33 = vsel %vm282_vm0, %v245_v3, 0.0  ;;  %v452_v7 = vsel %vm282_vm0, %v390_v50, 0.0  ;;  %v1453_v3 = vunpack.c.3.s8 %v891_v41 }
  0x33   :  { %v306_v24 = vadd.f32 %v305_v46, %v242_v32  ;;  %1445 = vst [vmem:[#allocation16_spill] sm:$0xff] %v1029_v39  ;;  %v450_v22 = vadd.f32 %v449_v38, %v448_v45  ;;  %v391_v46 = vmul.f32 %v60_v37, %v60_v37  ;;  %v1454_v50 = vunpack.c.3.s8 %v893_v42 }
  0x34   :  { %1449 = vst [vmem:[#allocation19_spill] sm:$0xff] %v1041_v11  ;;  %v1061_v9 = vcvt.s32.f32 %v1453_v3  ;;  %v1455_v37 = vunpack.c.0.s8 %v923_v30  ;;  %v1075_v45 = vcvt.s32.f32 %v1456_v61  ;;  %v249_v41 = vmul.f32 %v1029_v39, %v67_v19 }
  0x35   :  { %v308_v32 = vadd.f32 %v307_v28, %v306_v24  ;;  %v451_v27 = vadd.f32 %v450_v22, %v389_v18  ;;  %v1452_v24 = vunpack.c.2.s8 %v893_v42  ;;  %v1065_v38 = vcvt.s32.f32 %v1454_v50 }
  0x36   :  { %v1071_v18 = vcvt.s32.f32 %v1455_v37  ;;  %v313_v3 = vsel %vm282_vm0, %v247_v57, 0.0  ;;  %v394_v42 = vmul.f32 %v63_v63, %v63_v63  ;;  %v455_v50 = vsel %vm282_vm0, %v392_v58, 0.0  ;;  %v1093_v57 = vld [vmem:[#allocation2 + $0xd0] sm:$0xff] }
  0x37   :  { %v309_v43 = vadd.f32 %v308_v32, %v244_v4  ;;  %v1057_v28 = vcvt.s32.f32 %v1452_v24  ;;  %v1067_v4 = vld [vmem:[#allocation2 + $0xc0] sm:$0xff]  ;;  %v453_v22 = vadd.f32 %v452_v7, %v451_v27  ;;  %v69_v24 = vld [vmem:[#allocation2 + $0xc8] sm:$0xff]  ;;  %v248_v36 = vmul.f32 %v1025_v47, %v66_v25 }
  0x38   :  { %v538_v63 = vmul.f32 %v856_v6, %v856_v6  ;;  %v251_v58 = vmul.f32 %v1037_v10, %v69_v24  ;;  %v316_v27 = vsel %vm282_vm0, %v249_v41, 0.0  ;;  %v396_v61 = vmul.f32 %v65_v26, %v65_v26 }
  0x39   :  { %v311_v32 = vadd.f32 %v310_v33, %v309_v43  ;;  %v454_v37 = vadd.f32 %v453_v22, %v391_v46  ;;  %v1458_v33 = vunpack.c.1.s8 %v925_v35  ;;  %v250_v43 = vmul.f32 %v1033_v49, %v1067_v4  ;;  %v71_v46 = vld [vmem:[#allocation2 + $0xd8] sm:$0xff] }
  0x3a   :  { %v593_v22 = vsel %vm282_vm0, %v538_v63, 0.0  ;;  %v395_v49 = vmul.f32 %v64_v44, %v64_v44  ;;  %v539_v39 = vmul.f32 %v866_v16, %v866_v16  ;;  %v252_v8 = vmul.f32 %v1041_v11, %v1093_v57  ;;  %v73_v16 = vld [vmem:[#allocation2 + $0xe8] sm:$0xff] }
  0x3b   :  { %v312_v0 = vadd.f32 %v311_v32, %v246_v59  ;;  %v1087_v7 = vcvt.s32.f32 %v1458_v33  ;;  %v456_v59 = vadd.f32 %v455_v50, %v454_v37  ;;  %v458_v32 = vsel %vm282_vm0, %v394_v42, 0.0  ;;  %v1111_v42 = vld [vmem:[#allocation2 + $0xe0] sm:$0xff] }
  0x3c   :  { %v540_v26 = vmul.f32 %v864_v13, %v864_v13  ;;  %v594_v41 = vadd.f32 %v593_v22, %v537_v55  ;;  %v398_v37 = vmul.f32 %v67_v19, %v67_v19  ;;  %v461_v63 = vsel %vm282_vm0, %v396_v61, 0.0 }
  0x3d   :  { %v314_v62 = vadd.f32 %v313_v3, %v312_v0  ;;  %v457_v6 = vadd.f32 %v456_v59, %v393_v40  ;;  %v1459_v0 = vunpack.c.2.s8 %v923_v30  ;;  %v319_v40 = vsel %vm282_vm0, %v251_v58, 0.0 }
  0x3e   :  { %v596_v59 = vsel %vm282_vm0, %v540_v26, 0.0  ;;  %v397_v11 = vmul.f32 %v66_v25, %v66_v25  ;;  %v541_v13 = vmul.f32 %v884_v34, %v884_v34  ;;  %v1460_v55 = vunpack.c.2.s8 %v925_v35  ;;  %v75_v34 = vld [vmem:[#allocation2 + $0xf8] sm:$0xff] }
  0x3f   :  { %v315_v33 = vadd.f32 %v314_v62, %v248_v36  ;;  %v1105_v3 = vcvt.s32.f32 %v1459_v0  ;;  %v253_v36 = vmul.f32 %v1045_v52, %v71_v46  ;;  %v459_v50 = vadd.f32 %v458_v32, %v457_v6 }
  0x40   :  { %v595_v62 = vadd.f32 %v594_v41, %v539_v39  ;;  %v1121_v22 = vcvt.s32.f32 %v1460_v55  ;;  %v254_v58 = vmul.f32 %v1053_v21, %v1111_v42  ;;  %v542_v19 = vmul.f32 %v879_v29, %v879_v29  ;;  %v1127_v39 = vld [vmem:[#allocation2 + $0xf0] sm:$0xff] }
  0x41   :  { %v317_v44 = vadd.f32 %v316_v27, %v315_v33  ;;  %v460_v10 = vadd.f32 %v459_v50, %v395_v49  ;;  %v322_v49 = vsel %vm282_vm0, %v253_v36, 0.0  ;;  %v400_v32 = vmul.f32 %v69_v24, %v69_v24 }
  0x42   :  { %v597_v27 = vadd.f32 %v596_v59, %v595_v62  ;;  %v464_v33 = vsel %vm282_vm0, %v398_v37, 0.0  ;;  %v599_v26 = vsel %vm282_vm0, %v542_v19, 0.0  ;;  %v399_v29 = vmul.f32 %v1067_v4, %v1067_v4  ;;  %v1145_v37 = vld [vmem:[#allocation2 + $0x100] sm:$0xff] }
  0x43   :  { %v318_v0 = vadd.f32 %v317_v44, %v250_v43  ;;  %v255_v43 = vmul.f32 %v1057_v28, %v73_v16  ;;  %v462_v61 = vadd.f32 %v461_v63, %v460_v10  ;;  %v543_v50 = vmul.f32 %v904_v53, %v904_v53  ;;  %v77_v53 = vld [vmem:[#allocation2 + $0x108] sm:$0xff] }
  0x44   :  { %v598_v6 = vadd.f32 %v597_v27, %v541_v13  ;;  %v256_v10 = vmul.f32 %v1061_v9, %v1127_v39  ;;  %v544_v24 = vmul.f32 %v899_v48, %v899_v48  ;;  %v402_v59 = vmul.f32 %v71_v46, %v71_v46 }
  0x45   :  { %v320_v25 = vadd.f32 %v319_v40, %v318_v0  ;;  %v463_v44 = vadd.f32 %v462_v61, %v397_v11  ;;  %v1461_v40 = vunpack.c.3.s8 %v923_v30  ;;  %v325_v11 = vsel %vm282_vm0, %v255_v43, 0.0 }
  0x46   :  { %v600_v36 = vadd.f32 %v599_v26, %v598_v6  ;;  %v467_v30 = vsel %vm282_vm0, %v400_v32, 0.0  ;;  %v602_v13 = vsel %vm282_vm0, %v544_v24, 0.0  ;;  %v401_v48 = vmul.f32 %v1093_v57, %v1093_v57  ;;  %v1163_v32 = vld [vmem:[#allocation2 + $0x110] sm:$0xff] }
  0x47   :  { %v321_v41 = vadd.f32 %v320_v25, %v252_v8  ;;  %v1139_v62 = vcvt.s32.f32 %v1461_v40  ;;  %v257_v8 = vmul.f32 %v1065_v38, %v75_v34  ;;  %v465_v63 = vadd.f32 %v464_v33, %v463_v44 }
  0x48   :  { %v601_v0 = vadd.f32 %v600_v36, %v543_v50  ;;  %v545_v27 = vmul.f32 %v916_v12, %v916_v12  ;;  %v1462_v25 = vunpack.c.3.s8 %v925_v35  ;;  %v258_v46 = vmul.f32 %v1071_v18, %v1145_v37  ;;  %v79_v12 = vld [vmem:[#allocation2 + $0x118] sm:$0xff] }
  0x49   :  { %v323_v4 = vadd.f32 %v322_v49, %v321_v41  ;;  %v466_v19 = vadd.f32 %v465_v63, %v399_v29  ;;  %v546_v43 = vmul.f32 %v912_v1, %v912_v1  ;;  %v328_v33 = vsel %vm282_vm0, %v257_v8, 0.0 }
  0x4a   :  { %v1157_v49 = vcvt.s32.f32 %v1462_v25  ;;  %v603_v61 = vadd.f32 %v602_v13, %v601_v0  ;;  %v404_v26 = vmul.f32 %v73_v16, %v73_v16  ;;  %v470_v35 = vsel %vm282_vm0, %v402_v59, 0.0 }
  0x4b   :  { %v324_v55 = vadd.f32 %v323_v4, %v254_v58  ;;  %v259_v58 = vmul.f32 %v1075_v45, %v77_v53  ;;  %v468_v6 = vadd.f32 %v467_v30, %v466_v19  ;;  %v605_v29 = vsel %vm282_vm0, %v546_v43, 0.0 }
  0x4c   :  { %v604_v41 = vadd.f32 %v603_v61, %v545_v27  ;;  %v403_v1 = vmul.f32 %v1111_v42, %v1111_v42  ;;  %v547_v40 = vmul.f32 %v927_v14, %v927_v14  ;;  %v1463_v24 = vunpack.c.0.s8 %v955_v54  ;;  %v81_v14 = vld [vmem:[#allocation2 + $0x128] sm:$0xff] }
  0x4d   :  { %v326_v57 = vadd.f32 %v325_v11, %v324_v55  ;;  %v469_v50 = vadd.f32 %v468_v6, %v401_v48  ;;  %v260_v16 = vmul.f32 %v1083_v20, %v1163_v32  ;;  %v548_v8 = vmul.f32 %v929_v23, %v929_v23  ;;  %v1181_v11 = vld [vmem:[#allocation2 + $0x120] sm:$0xff] }
  0x4e   :  { %v1175_v36 = vcvt.s32.f32 %v1463_v24  ;;  %v606_v4 = vadd.f32 %v605_v29, %v604_v41  ;;  %v331_v63 = vsel %vm282_vm0, %v259_v58, 0.0  ;;  %v406_v30 = vmul.f32 %v75_v34, %v75_v34 }
  0x4f   :  { %v327_v44 = vadd.f32 %v326_v57, %v256_v10  ;;  %v261_v10 = vmul.f32 %v1087_v7, %v79_v12  ;;  %v471_v59 = vadd.f32 %v470_v35, %v469_v50  ;;  %v473_v0 = vsel %vm282_vm0, %v404_v26, 0.0  ;;  %v1199_v57 = vld [vmem:[#allocation2 + $0x130] sm:$0xff] }
  0x50   :  { %v607_v13 = vadd.f32 %v606_v4, %v547_v40  ;;  %v608_v55 = vsel %vm282_vm0, %v548_v8, 0.0  ;;  %v405_v23 = vmul.f32 %v1127_v39, %v1127_v39  ;;  %v549_v27 = vmul.f32 %v941_v31, %v941_v31  ;;  %v83_v31 = vld [vmem:[#allocation2 + $0x138] sm:$0xff] }
  0x51   :  { %v329_v42 = vadd.f32 %v328_v33, %v327_v44  ;;  %v472_v19 = vadd.f32 %v471_v59, %v403_v1  ;;  %v1464_v25 = vunpack.c.0.s8 %v957_v51  ;;  %v262_v34 = vmul.f32 %v1105_v3, %v1181_v11 }
  0x52   :  { %v550_v61 = vmul.f32 %v945_v2, %v945_v2  ;;  %v609_v58 = vadd.f32 %v608_v55, %v607_v13  ;;  %v334_v33 = vsel %vm282_vm0, %v261_v10, 0.0  ;;  %v408_v26 = vmul.f32 %v77_v53, %v77_v53  ;;  %v1217_v10 = vld [vmem:[#allocation2 + $0x140] sm:$0xff] }
  0x53   :  { %v330_v48 = vadd.f32 %v329_v42, %v258_v46  ;;  %v1193_v43 = vcvt.s32.f32 %v1464_v25  ;;  %v263_v46 = vmul.f32 %v1121_v22, %v81_v14  ;;  %v474_v6 = vadd.f32 %v473_v0, %v472_v19 }
  0x54   :  { %v476_v35 = vsel %vm282_vm0, %v406_v30, 0.0  ;;  %v610_v41 = vadd.f32 %v609_v58, %v549_v27  ;;  %v611_v29 = vsel %vm282_vm0, %v550_v61, 0.0  ;;  %v407_v2 = vmul.f32 %v1145_v37, %v1145_v37 }
  0x55   :  { %v332_v39 = vadd.f32 %v331_v63, %v330_v48  ;;  %v475_v1 = vadd.f32 %v474_v6, %v405_v23  ;;  %v551_v50 = vmul.f32 %v961_v17, %v961_v17  ;;  %v1465_v40 = vunpack.c.1.s8 %v955_v54  ;;  %v85_v17 = vld [vmem:[#allocation2 + $0x148] sm:$0xff] }
  0x56   :  { %v264_v53 = vmul.f32 %v1139_v62, %v1199_v57  ;;  %v552_v8 = vmul.f32 %v965_v56, %v965_v56  ;;  %v612_v4 = vadd.f32 %v611_v29, %v610_v41  ;;  %v337_v42 = vsel %vm282_vm0, %v263_v46, 0.0 }
  0x57   :  { %v333_v44 = vadd.f32 %v332_v39, %v260_v16  ;;  %v1211_v24 = vcvt.s32.f32 %v1465_v40  ;;  %v265_v16 = vmul.f32 %v1157_v49, %v83_v31  ;;  %v477_v63 = vadd.f32 %v476_v35, %v475_v1  ;;  %v86_v39 = vld [vmem:[#allocation2 + $0x150] sm:$0xff]  ;;  %v1469_v40 = vld [vmem:[#allocation13_spill] sm:$0xff] }
  0x58   :  { %v410_v59 = vmul.f32 %v79_v12, %v79_v12  ;;  %v479_v30 = vsel %vm282_vm0, %v408_v26, 0.0  ;;  %v613_v0 = vadd.f32 %v612_v4, %v551_v50  ;;  %v614_v13 = vsel %vm282_vm0, %v552_v8, 0.0 }
  0x59   :  { %v335_v37 = vadd.f32 %v334_v33, %v333_v44  ;;  %v409_v56 = vmul.f32 %v1163_v32, %v1163_v32  ;;  %v478_v48 = vadd.f32 %v477_v63, %v407_v2  ;;  %v553_v23 = vmul.f32 %v977_v5, %v977_v5  ;;  %v87_v33 = vld [vmem:[#allocation2 + $0x158] sm:$0xff] }
  0x5a   :  { %v1466_v19 = vunpack.c.1.s8 %v957_v51  ;;  %v266_v12 = vmul.f32 %v1175_v36, %v1217_v10  ;;  %v554_v25 = vmul.f32 %v981_v15, %v981_v15  ;;  %v615_v61 = vadd.f32 %v614_v13, %v613_v0 }
  0x5b   :  { %v336_v55 = vadd.f32 %v335_v37, %v262_v34  ;;  %v267_v34 = vmul.f32 %v1193_v43, %v85_v17  ;;  %v340_v32 = vsel %vm282_vm0, %v265_v16, 0.0  ;;  %v480_v46 = vadd.f32 %v479_v30, %v478_v48 }
  0x5c   :  { %v1229_v27 = vcvt.s32.f32 %v1466_v19  ;;  %v412_v5 = vmul.f32 %v81_v14, %v81_v14  ;;  %v482_v6 = vsel %vm282_vm0, %v410_v59, 0.0  ;;  %v616_v26 = vadd.f32 %v615_v61, %v553_v23  ;;  %v1470_v23 = vld [vmem:[#allocation12_spill] sm:$0xff] }
  0x5d   :  { %v338_v58 = vadd.f32 %v337_v42, %v336_v55  ;;  %v617_v35 = vsel %vm282_vm0, %v554_v25, 0.0  ;;  %v411_v29 = vmul.f32 %v1181_v11, %v1181_v11  ;;  %v481_v15 = vadd.f32 %v480_v46, %v409_v56  ;;  %v89_v42 = vld [vmem:[#allocation2 + $0x168] sm:$0xff] }
  0x5e   :  { %v555_v44 = vmul.f32 %v997_v60, %v997_v60  ;;  %v1467_v2 = vunpack.c.2.s8 %v955_v54  ;;  %v1468_v50 = vunpack.c.2.s8 %v957_v51  ;;  %v556_v8 = vmul.f32 %v1469_v40, %v1469_v40  ;;  %v1475_v40 = vld [vmem:[#allocation11_spill] sm:$0xff] }
  0x5f   :  { %v339_v41 = vadd.f32 %v338_v58, %v264_v53  ;;  %v618_v4 = vadd.f32 %v617_v35, %v616_v26  ;;  %v1253_v53 = vld [vmem:[#allocation2 + $0x160] sm:$0xff]  ;;  %v268_v11 = vmul.f32 %v1211_v24, %v86_v39  ;;  %v269_v16 = vmul.f32 %v1229_v27, %v87_v33  ;;  %v1473_v35 = vld [vmem:[#allocation14_spill] sm:$0xff] }
  0x60   :  { %v1245_v1 = vcvt.s32.f32 %v1467_v2  ;;  %v1249_v14 = vcvt.s32.f32 %v1468_v50  ;;  %v483_v60 = vadd.f32 %v482_v6, %v481_v15  ;;  %v343_v63 = vsel %vm282_vm0, %v267_v34, 0.0  ;;  %v91_v6 = vld [vmem:[#allocation2 + $0x178] sm:$0xff]  ;;  %v1474_v2 = vld [vmem:[#allocation15_spill] sm:$0xff] }
  0x61   :  { %v341_v37 = vadd.f32 %v340_v32, %v339_v41  ;;  %v414_v59 = vmul.f32 %v83_v31, %v83_v31  ;;  %v485_v30 = vsel %vm282_vm0, %v412_v5, 0.0  ;;  %v619_v0 = vadd.f32 %v618_v4, %v555_v44  ;;  %v90_v5 = vld [vmem:[#allocation2 + $0x170] sm:$0xff] }
  0x62   :  { %v413_v55 = vmul.f32 %v1199_v57, %v1199_v57  ;;  %v484_v56 = vadd.f32 %v483_v60, %v411_v29  ;;  %v620_v48 = vsel %vm282_vm0, %v556_v8, 0.0  ;;  %v165_v19 = vunpack.c.1.s8 %v1470_v23 }
  0x63   :  { %v342_v13 = vadd.f32 %v341_v37, %v266_v12  ;;  %v1471_v25 = vunpack.c.3.s8 %v955_v54  ;;  %v1472_v58 = vunpack.c.3.s8 %v957_v51  ;;  %v270_v31 = vmul.f32 %v1245_v1, %v1253_v53 }
  0x64   :  { %v271_v12 = vmul.f32 %v1249_v14, %v89_v42  ;;  %v346_v57 = vsel %vm282_vm0, %v269_v16, 0.0  ;;  %v486_v46 = vadd.f32 %v485_v30, %v484_v56  ;;  %v416_v26 = vmul.f32 %v85_v17, %v85_v17 }
  0x65   :  { %v1265_v61 = vcvt.s32.f32 %v1471_v25  ;;  %v1269_v34 = vcvt.s32.f32 %v1472_v58  ;;  %v344_v32 = vadd.f32 %v343_v63, %v342_v13  ;;  %v488_v54 = vsel %vm282_vm0, %v414_v59, 0.0 }
  0x66   :  { %v557_v41 = vmul.f32 %v1473_v35, %v1473_v35  ;;  %v621_v51 = vadd.f32 %v620_v48, %v619_v0  ;;  %v415_v15 = vmul.f32 %v1217_v10, %v1217_v10  ;;  %v487_v44 = vadd.f32 %v486_v46, %v413_v55  ;;  %v93_v0 = vld [vmem:[#allocation2 + $0x188] sm:$0xff] }
  0x67   :  { %v345_v29 = vadd.f32 %v344_v32, %v268_v11  ;;  %v558_v50 = vmul.f32 %v1474_v2, %v1474_v2  ;;  %v166_v8 = vunpack.c.2.s8 %v1475_v40  ;;  %v167_v4 = vunpack.c.2.s8 %v1470_v23  ;;  %v92_v11 = vld [vmem:[#allocation2 + $0x180] sm:$0xff] }
  0x68   :  { %v1476_v17 = vunpack.c.0.s8 %v1475_v40  ;;  %v1477_v37 = vunpack.c.0.s8 %v1470_v23  ;;  %v272_v63 = vmul.f32 %v1265_v61, %v90_v5  ;;  %v273_v10 = vmul.f32 %v1269_v34, %v91_v6 }
  0x69   :  { %v347_v59 = vadd.f32 %v346_v57, %v345_v29  ;;  %v489_v30 = vadd.f32 %v488_v54, %v487_v44  ;;  %v349_v13 = vsel %vm282_vm0, %v271_v12, 0.0  ;;  %v418_v55 = vmul.f32 %v87_v33, %v87_v33  ;;  %v94_v12 = vld [vmem:[#allocation2 + $0x190] sm:$0xff] }
  0x6a   :  { %v1286_v16 = vcvt.s32.f32 %v1476_v17  ;;  %v1290_v60 = vcvt.s32.f32 %v1477_v37  ;;  %v491_v56 = vsel %vm282_vm0, %v416_v26, 0.0  ;;  %v622_v48 = vadd.f32 %v621_v51, %v557_v41  ;;  %v95_v41 = vld [vmem:[#allocation2 + $0x198] sm:$0xff] }
  0x6b   :  { %v348_v25 = vadd.f32 %v347_v59, %v270_v31  ;;  %v417_v58 = vmul.f32 %v86_v39, %v86_v39  ;;  %v490_v32 = vadd.f32 %v489_v30, %v415_v15  ;;  %v623_v46 = vsel %vm282_vm0, %v558_v50, 0.0  ;;  %v1479_v37 = vld [vmem:[#allocation16_spill] sm:$0xff] }
  0x6c   :  { %v168_v35 = vunpack.c.3.s8 %v1475_v40  ;;  %v1478_v2 = vunpack.c.1.s8 %v1475_v40  ;;  %v1302_v57 = vcvt.s32.f32 %v165_v19  ;;  %v274_v54 = vmul.f32 %v1286_v16, %v92_v11 }
  0x6d   :  { %v275_v33 = vmul.f32 %v1290_v60, %v93_v0  ;;  %v350_v26 = vadd.f32 %v349_v13, %v348_v25  ;;  %v352_v31 = vsel %vm282_vm0, %v273_v10, 0.0  ;;  %v492_v39 = vadd.f32 %v491_v56, %v490_v32 }
  0x6e   :  { %v1300_v17 = vcvt.s32.f32 %v1478_v2  ;;  %v420_v51 = vmul.f32 %v89_v42, %v89_v42  ;;  %v494_v29 = vsel %vm282_vm0, %v418_v55, 0.0  ;;  %v559_v15 = vmul.f32 %v1025_v47, %v1025_v47  ;;  %v96_v55 = vld [vmem:[#allocation2 + $0x1a0] sm:$0xff]  ;;  %v1480_v2 = vld [vmem:[#allocation18_spill] sm:$0xff] }
  0x6f   :  { %v624_v44 = vadd.f32 %v623_v46, %v622_v48  ;;  %v351_v50 = vadd.f32 %v350_v26, %v272_v63  ;;  %v419_v19 = vmul.f32 %v1253_v53, %v1253_v53  ;;  %v493_v40 = vadd.f32 %v492_v39, %v417_v58  ;;  %v97_v53 = vld [vmem:[#allocation2 + $0x1a8] sm:$0xff] }
  0x70   :  { %v560_v59 = vmul.f32 %v1479_v37, %v1479_v37  ;;  %v169_v30 = vunpack.c.3.s8 %v1470_v23  ;;  %v1315_v10 = vcvt.s32.f32 %v166_v8  ;;  %v1317_v13 = vcvt.s32.f32 %v167_v4 }
  0x71   :  { %v276_v42 = vmul.f32 %v1300_v17, %v94_v12  ;;  %v277_v47 = vmul.f32 %v1302_v57, %v95_v41  ;;  %v353_v56 = vadd.f32 %v352_v31, %v351_v50  ;;  %v355_v63 = vsel %vm282_vm0, %v275_v33, 0.0  ;;  %v1481_v31 = vld [vmem:[#allocation17_spill] sm:$0xff] }
  0x72   :  { %v495_v48 = vadd.f32 %v494_v29, %v493_v40  ;;  %v421_v25 = vmul.f32 %v90_v5, %v90_v5  ;;  %v422_v58 = vmul.f32 %v91_v6, %v91_v6  ;;  %v497_v32 = vsel %vm282_vm0, %v420_v51, 0.0  ;;  %v98_v6 = vld [vmem:[#allocation2 + $0x1b0] sm:$0xff] }
  0x73   :  { %v625_v46 = vadd.f32 %v624_v44, %v559_v15  ;;  %v354_v23 = vadd.f32 %v353_v56, %v274_v54  ;;  %v562_v4 = vmul.f32 %v1480_v2, %v1480_v2  ;;  %v626_v26 = vsel %vm282_vm0, %v560_v59, 0.0  ;;  %v99_v44 = vld [vmem:[#allocation2 + $0x1b8] sm:$0xff] }
  0x74   :  { %v496_v8 = vadd.f32 %v495_v48, %v419_v19  ;;  %v1326_v39 = vcvt.s32.f32 %v168_v35  ;;  %v1328_v37 = vcvt.s32.f32 %v169_v30  ;;  %v278_v33 = vmul.f32 %v1315_v10, %v96_v55 }
  0x75   :  { %v561_v5 = vmul.f32 %v1481_v31, %v1481_v31  ;;  %v279_v51 = vmul.f32 %v1317_v13, %v97_v53  ;;  %v356_v29 = vadd.f32 %v355_v63, %v354_v23  ;;  %v358_v54 = vsel %vm282_vm0, %v277_v47, 0.0  ;;  %v1482_v31 = vld [vmem:[#allocation19_spill] sm:$0xff] }
  0x76   :  { %v498_v15 = vadd.f32 %v497_v32, %v496_v8  ;;  %v423_v50 = vmul.f32 %v92_v11, %v92_v11  ;;  %v424_v19 = vmul.f32 %v93_v0, %v93_v0  ;;  %v500_v35 = vsel %vm282_vm0, %v422_v58, 0.0 }
  0x77   :  { %v627_v40 = vadd.f32 %v626_v26, %v625_v46  ;;  %v357_v59 = vadd.f32 %v356_v29, %v276_v42  ;;  %v564_v56 = vmul.f32 %v1045_v52, %v1045_v52  ;;  %v629_v48 = vsel %vm282_vm0, %v562_v4, 0.0 }
  0x78   :  { %v499_v30 = vadd.f32 %v498_v15, %v421_v25  ;;  %v280_v2 = vmul.f32 %v1326_v39, %v98_v6  ;;  %v563_v63 = vmul.f32 %v1482_v31, %v1482_v31  ;;  %v281_v32 = vmul.f32 %v1328_v37, %v99_v44 }
  0x79   :  { %v628_v47 = vadd.f32 %v627_v40, %v561_v5  ;;  %v359_v11 = vadd.f32 %v358_v54, %v357_v59  ;;  %v361_v0 = vsel %vm282_vm0, %v279_v51, 0.0  ;;  %v425_v46 = vmul.f32 %v94_v12, %v94_v12 }
  0x7a   :  { %v501_v58 = vadd.f32 %v500_v35, %v499_v30  ;;  %v426_v42 = vmul.f32 %v95_v41, %v95_v41  ;;  %v503_v25 = vsel %vm282_vm0, %v424_v19, 0.0  ;;  %v566_v4 = vmul.f32 %v1057_v28, %v1057_v28 }
  0x7b   :  { %v630_v23 = vadd.f32 %v629_v48, %v628_v47  ;;  %v360_v52 = vadd.f32 %v359_v11, %v278_v33  ;;  %v632_v26 = vsel %vm282_vm0, %v564_v56, 0.0  ;;  %v565_v5 = vmul.f32 %v1053_v21, %v1053_v21 }
  0x7c   :  { %v502_v8 = vadd.f32 %v501_v58, %v423_v50  ;;  %v364_v51 = vsel %vm282_vm0, %v281_v32, 0.0  ;;  %v427_v12 = vmul.f32 %v96_v55, %v96_v55  ;;  %v428_v41 = vmul.f32 %v97_v53, %v97_v53 }
  0x7d   :  { %v631_v29 = vadd.f32 %v630_v23, %v563_v63  ;;  %v362_v54 = vadd.f32 %v361_v0, %v360_v52  ;;  %v506_v19 = vsel %vm282_vm0, %v426_v42, 0.0  ;;  %v568_v28 = vmul.f32 %v1065_v38, %v1065_v38 }
  0x7e   :  { %v504_v15 = vadd.f32 %v503_v25, %v502_v8  ;;  %v635_v40 = vsel %vm282_vm0, %v566_v4, 0.0  ;;  %v567_v21 = vmul.f32 %v1061_v9, %v1061_v9  ;;  %v430_v48 = vmul.f32 %v99_v44, %v99_v44 }
  0x7f   :  { %v633_v35 = vadd.f32 %v632_v26, %v631_v29  ;;  %v363_v33 = vadd.f32 %v362_v54, %v280_v2  ;;  %v509_v55 = vsel %vm282_vm0, %v428_v41, 0.0  ;;  %v429_v31 = vmul.f32 %v98_v6, %v98_v6 }
  0x80   :  { %v505_v50 = vadd.f32 %v504_v15, %v425_v46  ;;  %v570_v2 = vmul.f32 %v1075_v45, %v1075_v45  ;;  %v638_v38 = vsel %vm282_vm0, %v568_v28, 0.0  ;;  %v569_v47 = vmul.f32 %v1071_v18, %v1071_v18 }
  0x81   :  { %v634_v59 = vadd.f32 %v633_v35, %v565_v5  ;;  %v365_v30 = vadd.f32 %v364_v51, %v363_v33  ;;  %v512_v11 = vsel %vm282_vm0, %v430_v48, 0.0  ;;  %v572_v58 = vmul.f32 %v1087_v7, %v1087_v7 }
  0x82   :  { %v507_v56 = vadd.f32 %v506_v19, %v505_v50  ;;  %v641_v6 = vsel %vm282_vm0, %v570_v2, 0.0  ;;  %v571_v46 = vmul.f32 %v1083_v20, %v1083_v20  ;;  %v574_v18 = vmul.f32 %v1121_v22, %v1121_v22 }
  0x83   :  { %v636_v53 = vadd.f32 %v635_v40, %v634_v59  ;;  %366 = vadd.xlane.f32.xlu0 %v365_v30  ;;  %v644_v23 = vsel %vm282_vm0, %v572_v58, 0.0  ;;  %v573_v52 = vmul.f32 %v1105_v3, %v1105_v3  ;;  %v576_v7 = vmul.f32 %v1157_v49, %v1157_v49 }
  0x84   :  { %v508_v63 = vadd.f32 %v507_v56, %v427_v12  ;;  %v647_v26 = vsel %vm282_vm0, %v574_v18, 0.0  ;;  %v575_v20 = vmul.f32 %v1139_v62, %v1139_v62  ;;  %v578_v22 = vmul.f32 %v1193_v43, %v1193_v43 }
  0x85   :  { %v637_v32 = vadd.f32 %v636_v53, %v567_v21  ;;  %v650_v54 = vsel %vm282_vm0, %v576_v7, 0.0  ;;  %v577_v3 = vmul.f32 %v1175_v36, %v1175_v36  ;;  %v580_v49 = vmul.f32 %v1229_v27, %v1229_v27 }
  0x86   :  { %v510_v9 = vadd.f32 %v509_v55, %v508_v63  ;;  %v653_v12 = vsel %vm282_vm0, %v578_v22, 0.0  ;;  %v579_v62 = vmul.f32 %v1211_v24, %v1211_v24  ;;  %v582_v43 = vmul.f32 %v1249_v14, %v1249_v14 }
  0x87   :  { %v639_v0 = vadd.f32 %v638_v38, %v637_v32  ;;  %v656_v35 = vsel %vm282_vm0, %v580_v49, 0.0  ;;  %v581_v36 = vmul.f32 %v1245_v1, %v1245_v1  ;;  %v584_v27 = vmul.f32 %v1269_v34, %v1269_v34 }
  0x88   :  { %v511_v44 = vadd.f32 %v510_v9, %v429_v31  ;;  %v659_v28 = vsel %vm282_vm0, %v582_v43, 0.0  ;;  %v583_v24 = vmul.f32 %v1265_v61, %v1265_v61  ;;  %v586_v14 = vmul.f32 %v1290_v60, %v1290_v60 }
  0x89   :  { %v640_v45 = vadd.f32 %v639_v0, %v569_v47  ;;  %v662_v59 = vsel %vm282_vm0, %v584_v27, 0.0  ;;  %v585_v1 = vmul.f32 %v1286_v16, %v1286_v16  ;;  %v588_v34 = vmul.f32 %v1302_v57, %v1302_v57 }
  0x8a   :  { %v513_v42 = vadd.f32 %v512_v11, %v511_v44  ;;  %v665_v48 = vsel %vm282_vm0, %v586_v14, 0.0  ;;  %v587_v61 = vmul.f32 %v1300_v17, %v1300_v17  ;;  %v590_v60 = vmul.f32 %v1317_v13, %v1317_v13 }
  0x8b   :  { %v642_v25 = vadd.f32 %v641_v6, %v640_v45  ;;  %v668_v31 = vsel %vm282_vm0, %v588_v34, 0.0  ;;  %v589_v16 = vmul.f32 %v1315_v10, %v1315_v10  ;;  %v592_v57 = vmul.f32 %v1328_v37, %v1328_v37 }
  0x8c   :  { %514 = vadd.xlane.f32.xlu0 %v513_v42  ;;  %v671_v38 = vsel %vm282_vm0, %v590_v60, 0.0  ;;  %v591_v17 = vmul.f32 %v1326_v39, %v1326_v39 }
  0x8d   :  { %v643_v8 = vadd.f32 %v642_v25, %v571_v46  ;;  %v674_v9 = vsel %vm282_vm0, %v592_v57, 0.0 }
  0x8f   :  { %v645_v4 = vadd.f32 %v644_v23, %v643_v8 }
  0x91   :  { %v646_v5 = vadd.f32 %v645_v4, %v573_v52 }
  0x93   :  { %v648_v29 = vadd.f32 %v647_v26, %v646_v5 }
  0x95   :  { %v649_v51 = vadd.f32 %v648_v29, %v575_v20 }
  0x97   :  { %v651_v15 = vadd.f32 %v650_v54, %v649_v51 }
  0x99   :  { %v652_v41 = vadd.f32 %v651_v15, %v577_v3 }
  0x9b   :  { %v654_v19 = vadd.f32 %v653_v12, %v652_v41 }
  0x9d   :  { %v655_v33 = vadd.f32 %v654_v19, %v579_v62 }
  0x9f   :  { %v657_v50 = vadd.f32 %v656_v35, %v655_v33 }
  0xa1   :  { %v658_v40 = vadd.f32 %v657_v50, %v581_v36 }
  0xa3   :  { %v660_v21 = vadd.f32 %v659_v28, %v658_v40 }
  0xa5   :  { %v661_v30 = vadd.f32 %v660_v21, %v583_v24 }
  0xa7   :  { %v663_v56 = vadd.f32 %v662_v59, %v661_v30 }
  0xa9   :  { %v664_v55 = vadd.f32 %v663_v56, %v585_v1 }
  0xab   :  { %v666_v53 = vadd.f32 %v665_v48, %v664_v55 }
  0xad   :  { %v667_v63 = vadd.f32 %v666_v53, %v587_v61 }
  0xaf   :  { %v669_v2 = vadd.f32 %v668_v31, %v667_v63 }
  0xb1   :  { %v670_v47 = vadd.f32 %v669_v2, %v589_v16 }
  0xb3   :  { %v672_v32 = vadd.f32 %v671_v38, %v670_v47 }
  0xb5   :  { %v673_v13 = vadd.f32 %v672_v32, %v591_v17 }
  0xb7   :  { %v675_v11 = vadd.f32 %v674_v9, %v673_v13 }
  0xb9   :  { %676 = vadd.xlane.f32.xlu1 %v675_v11 }
  0xf6   :  { %v367_v0 = vpop.xlane.xlu0 %366 }
  0xf7   :  { %v368_v44 = vrot.slane %v367_v0, 4 }
  0xf9   :  { %v369_v10 = vadd.f32 %v368_v44, %v367_v0 }
  0xfb   :  { %v370_v58 = vrot.slane %v369_v10, 2 }
  0xfd   :  { %v371_v6 = vadd.f32 %v370_v58, %v369_v10 }
  0xff   :  { %v515_v46 = vpop.xlane.xlu0 %514  ;;  %v372_v37 = vrot.slane %v371_v6, 1 }
 0x100   :  { %v516_v45 = vrot.slane %v515_v46, 4 }
 0x101   :  { %v373_v25 = vadd.f32 %v372_v37, %v371_v6 }
 0x102   :  { %v517_v42 = vadd.f32 %v516_v45, %v515_v46 }
 0x103   :  { %739 = vpush %v373_v25 }
 0x104   :  { %v518_v18 = vrot.slane %v517_v42, 2 }
 0x106   :  { %v519_v39 = vadd.f32 %v518_v18, %v517_v42 }
 0x108   :  { %v520_v23 = vrot.slane %v519_v39, 1 }
 0x10a   :  { %v521_v52 = vadd.f32 %v520_v23, %v519_v39 }
 0x10c   :  { %741 = vpush %v521_v52 }
 0x12c   :  { %v677_v8 = vpop.xlane.xlu1 %676 }
 0x12d   :  { %v678_v7 = vrot.slane %v677_v8, 4 }
 0x12f   :  { %v679_v26 = vadd.f32 %v678_v7, %v677_v8 }
 0x131   :  { %v680_v29 = vrot.slane %v679_v26, 2 }
 0x133   :  { %v681_v3 = vadd.f32 %v680_v29, %v679_v26 }
 0x134   :  { %s1420_s0 = spop %739 }
 0x135   :  { %v682_v49 = vrot.slane %v681_v3, 1 }
 0x137   :  { %v683_v43 = vadd.f32 %v682_v49, %v681_v3 }
 0x13d   :  { %s742_s1 = spop %741 }
 0x13e   :  { %v523_v4 = vstv %s742_s1 }
 0x13f   :  { %757 = vrsqrt.f32 %v523_v4  ;;  %vm531_vm1 = vcmp.eq.f32.partialorder %v523_v4, inf  ;;  %v534_v62 = vand.u32 2147483648, %v523_v4  ;;  %vm533_vm2 = vcmp.eq.f32.partialorder %v523_v4, 0.0 }
 0x145   :  { %v758_v20 = vpop.eup %757 }
 0x146   :  { %v525_v5 = vmul.f32 %v758_v20, %v523_v4 }
 0x148   :  { %v526_v22 = vmul.f32 %v758_v20, %v525_v5 }
 0x14a   :  { %v527_v54 = vmul.f32 0.5, %v526_v22 }
 0x14c   :  { %v528_v51 = vsub.f32 1.5, %v527_v54 }
 0x14e   :  { %v529_v15 = vmul.f32 %v758_v20, %v528_v51 }
 0x150   :  { %v530_v12 = vmul.f32 %v529_v15, %v523_v4 }
 0x152   :  { %v532_v41 = vsel %vm531_vm1, %v523_v4, %v530_v12 }
 0x153   :  { %v535_v19 = vsel %vm533_vm2, %v534_v62, %v532_v41 }
 0x154   :  { %743 = vpush %v535_v19 }
 0x155   :  { %745 = vpush %v683_v43 }
 0x185   :  { %s744_s21 = spop %743 }
 0x186   :  { %s746_s22 = spop %745  ;;  %s699_s25 = smax.f32 %s833_s24, %s744_s21 }
 0x187   :  { %v685_v35 = vstv %s746_s22 }
 0x188   :  { %759 = vrsqrt.f32 %v685_v35  ;;  %vm693_vm3 = vcmp.eq.f32.partialorder %v685_v35, inf  ;;  %v696_v21 = vand.u32 2147483648, %v685_v35  ;;  %vm695_vm4 = vcmp.eq.f32.partialorder %v685_v35, 0.0 }
 0x18e   :  { %v760_v36 = vpop.eup %759 }
 0x18f   :  { %v687_v33 = vmul.f32 %v760_v36, %v685_v35 }
 0x191   :  { %v688_v50 = vmul.f32 %v760_v36, %v687_v33 }
 0x193   :  { %v689_v27 = vmul.f32 0.5, %v688_v50 }
 0x195   :  { %v690_v28 = vsub.f32 1.5, %v689_v27 }
 0x197   :  { %v691_v24 = vmul.f32 %v760_v36, %v690_v28 }
 0x199   :  { %v692_v40 = vmul.f32 %v691_v24, %v685_v35 }
 0x19b   :  { %v694_v14 = vsel %vm693_vm3, %v685_v35, %v692_v40 }
 0x19c   :  { %v697_v59 = vsel %vm695_vm4, %v696_v21, %v694_v14 }
 0x19d   :  { %747 = vpush %v697_v59 }
 0x1ce   :  { %s748_s23 = spop %747 }
 0x1cf   :  { %s700_s26 = smax.f32 %s833_s24, %s748_s23 }
 0x1d0   :  { %s701_s27 = smul.f32 %s700_s26, %s699_s25 }
 0x1d2   :  { %v702_v1 = vstv %s701_s27 }
 0x1d3   :  { %761 = vrcp.f32 %v702_v1  ;;  %v714_v48 = vand.u32 2147483648, %v702_v1  ;;  %v712_v55 = vand.u32 2147483647, %v702_v1  ;;  %vm708_vm6 = vweird.f32 %v702_v1 }
 0x1d5   :  { %v715_v60 = vor.u32 1.1754944e-38, %v714_v48  ;;  %vm713_vm8 = vcmp.eq.f32.partialorder %v712_v55, 8.507059e+37 }
 0x1d9   :  { %v762_v30 = vpop.eup %761 }
 0x1da   :  { %v704_v56 = vmul.f32 %v762_v30, %v702_v1  ;;  %vm709_vm5 = vweird.f32 %v762_v30 }
 0x1db   :  { %vm710_vm7 = vmor %vm708_vm6, %vm709_vm5 }
 0x1dc   :  { %v705_v34 = vsub.f32 1.0, %v704_v56 }
 0x1de   :  { %v706_v61 = vmul.f32 %v762_v30, %v705_v34 }
 0x1e0   :  { %v707_v53 = vadd.f32 %v762_v30, %v706_v61 }
 0x1e2   :  { %v711_v31 = vsel %vm710_vm7, %v762_v30, %v707_v53 }
 0x1e3   :  { %v716_v16 = vsel %vm713_vm8, %v715_v60, %v711_v31 }
 0x1e4   :  { %749 = vpush %v716_v16 }
 0x215   :  { %s750_s3 = spop %749 }
 0x216   :  { %s718_s4 = smul.f32 %s750_s3, %s1420_s0 }
 0x218   :  { %s719_s5 = ssub.f32 1.0, %s718_s4 }
 0x21a   :  { %721 = sst [smem:[#allocation7]] %s719_s5 }
 0x21b   :  { %730 = dma.smem_to_hbm %s834_s6, 16, %s728_s30, [#allocation4]  }
 0x21c   :  { %827 = dma.done.wait [#allocation4], 16  }
 0x21d   :  { %828 = vsyncadd [#allocation4], 4294967280 }
 0x21e   :  { %735 = sfence }
 0x21f   :  { %736 = vsyncpa [#allocation3], 1 }
 0x220   :  { %737 = vsyncpa [#allocation6], 1 }
 0x221   :  { %738 = vsyncpa [#allocation4], 1 }

</bundles_post_ra>
